<compile_context>
chip_gen: v7x
topology: tpu7x:2x2x1
jax: 0.10.0
libtpu: 0.0.40
codegen_flags: <defaults>
</compile_context>

<pallas_src>
import functools

import jax
import jax.numpy as jnp
from jax import lax
from jax.experimental import pallas as pl
from jax.experimental.pallas import tpu as pltpu


def _rot_lanes(a, delta, n):
    """Circular shift along the last (lane) axis: out[..., p] = a[..., (p+delta) % n].

    `delta` is a static Python int.  Written as slice+concat so the direction
    is unambiguous; Mosaic lowers it to an XLU lane rotation.
    """
    d = delta % n
    if d == 0:
        return a
    return jnp.concatenate([a[..., d:], a[..., :d]], axis=-1)


def _dwpw_conv(x, wdw, wpw, rowm, colm, *, W, HW, P, Cin, Cout):
    """Depthwise 3x3 (stride 1, pad 1) + pointwise 1x1 on packed-sublane data.

    x:    (NB, P*Cin, HW)   P images packed along sublanes, pixels on lanes
    wdw:  (P*Cin, 9)        depthwise taps, column k <-> (dy, dx) = divmod(k, 3)
    wpw:  (Cout, Cin)       pointwise weights (scale may already be folded in)
    rowm: (2, HW)           row masks for the dy=-1 / dy=+1 vertical taps
    colm: (2, HW)           column masks for the dx=-1 / dx=+1 horizontal taps
    returns (NB, P*Cout, HW)
    """
    # Vertical taps: shift the flattened pixel axis by +-W; wrapped rows are
    # exactly the invalid (out-of-image) rows and are zeroed by the row masks.
    v_up = _rot_lanes(x, -W, HW) * rowm[0:1, :]   # x[p - W], valid for p >= W
    v_dn = _rot_lanes(x, W, HW) * rowm[1:2, :]    # x[p + W], valid for p < HW - W
    v_mid = x

    # Group taps by dx: u[d] combines the three dy taps of kernel column d.
    u = []
    for d in range(3):
        u.append(v_up * wdw[:, d:d + 1]
                 + v_mid * wdw[:, 3 + d:3 + d + 1]
                 + v_dn * wdw[:, 6 + d:6 + d + 1])

    # Horizontal taps: one +-1 lane shift per side column, one mask each
    # (2 mask multiplies per step instead of 6).
    acc = (u[1]
           + _rot_lanes(u[0], -1, HW) * colm[0:1, :]
           + _rot_lanes(u[2], 1, HW) * colm[1:2, :])

    # Pointwise 1x1 on the VPU: Cin broadcast FMAs per output-channel plane,
    # independently for each packed image slot.
    slots = []
    for p in range(P):
        s = acc[:, p * Cin:p * Cin + 1, :] * wpw[:, 0:1]
        for ci in range(1, Cin):
            s = s + acc[:, p * Cin + ci:p * Cin + ci + 1, :] * wpw[:, ci:ci + 1]
        slots.append(s)
    return slots[0] if P == 1 else jnp.concatenate(slots, axis=1)


def _stats_kernel(x_ref, wdw_ref, wpw_ref, rowm_ref, colm_ref,
                  sum_ref, sumsq_ref, *, W, HW, P, Cin, Cout):
    # Emits per-step partial BN statistics only (no pw writeback to HBM).
    pw = _dwpw_conv(x_ref[...], wdw_ref[...], wpw_ref[...],
                    rowm_ref[...], colm_ref[...],
                    W=W, HW=HW, P=P, Cin=Cin, Cout=Cout)
    sum_ref[...] = jnp.sum(jnp.sum(pw, axis=2, keepdims=True),
                           axis=0, keepdims=True)
    sumsq_ref[...] = jnp.sum(jnp.sum(pw * pw, axis=2, keepdims=True),
                             axis=0, keepdims=True)


def _apply_kernel(x_ref, wdw_ref, wpws_ref, shift_ref, rowm_ref, colm_ref,
                  o_ref, *, W, HW, P, Cin, Cout):
    # Recompute the cheap conv (memory-bound regime) and apply the BN affine.
    # The BN scale is already folded into the pointwise weights.
    pw = _dwpw_conv(x_ref[...], wdw_ref[...], wpws_ref[...],
                    rowm_ref[...], colm_ref[...],
                    W=W, HW=HW, P=P, Cin=Cin, Cout=Cout)
    o_ref[...] = pw + shift_ref[...]


def _pick_batch_tile(groups, bytes_per_group, budget=4 << 20):
    """Largest divisor of `groups` whose per-step footprint stays small."""
    nb = 1
    for d in range(1, groups + 1):
        if groups % d == 0 and d * bytes_per_group <= budget:
            nb = d
    return nb


@jax.jit
def separable_conv_block(x_nchw, w_dw, w_pw, b_pw, gamma, beta, eps=1e-5):
    """x_nchw: (N, Cin, H, W); w_dw: (Cin,1,3,3); w_pw: (Cout,Cin,1,1)."""
    N, Cin, H, W = x_nchw.shape
    Cout = w_pw.shape[0]
    HW = H * W
    f32 = jnp.float32

    # Sublane packing: stack P images' channels so the 8 f32 sublanes are full.
    P = 1
    for p in range(max(8 // max(Cin, 1), 1), 0, -1):
        if N % p == 0:
            P = p
            break
    PCin, PCout = P * Cin, P * Cout
    G = N // P
    NB = _pick_batch_tile(G, (PCin + 2 * PCout) * HW * 4 * 2)
    NSTEP = G // NB

    x_flat = x_nchw.astype(f32).reshape(G, PCin, HW)              # free reshape
    wdw = jnp.tile(w_dw[:, 0, :, :].reshape(Cin, 9).astype(f32), (P, 1))
    wpw = w_pw[:, :, 0, 0].astype(f32)                            # (Cout, Cin)

    idx = jnp.arange(HW, dtype=jnp.int32)
    rowm = jnp.stack([idx >= W, idx < HW - W]).astype(f32)        # (2, HW)
    col = idx % W
    colm = jnp.stack([col != 0, col != W - 1]).astype(f32)        # (2, HW)

    # ---- pass 1: conv + per-step partial BN stats (parallel batch axis) ----
    stats_kernel = functools.partial(_stats_kernel, W=W, HW=HW, P=P,
                                     Cin=Cin, Cout=Cout)
    sums, sumsqs = pl.pallas_call(
        stats_kernel,
        grid=(NSTEP,),
        in_specs=[
            pl.BlockSpec((NB, PCin, HW), lambda i: (i, 0, 0)),
            pl.BlockSpec((PCin, 9), lambda i: (0, 0)),
            pl.BlockSpec((Cout, Cin), lambda i: (0, 0)),
            pl.BlockSpec((2, HW), lambda i: (0, 0)),
            pl.BlockSpec((2, HW), lambda i: (0, 0)),
        ],
        out_specs=[
            pl.BlockSpec((1, PCout, 1), lambda i: (i, 0, 0)),
            pl.BlockSpec((1, PCout, 1), lambda i: (i, 0, 0)),
        ],
        out_shape=[
            jax.ShapeDtypeStruct((NSTEP, PCout, 1), f32),
            jax.ShapeDtypeStruct((NSTEP, PCout, 1), f32),
        ],
        compiler_params=pltpu.CompilerParams(
            dimension_semantics=("parallel",),
        ),
    )(x_flat, wdw, wpw, rowm, colm)

    # ---- fold global batch stats into a per-channel affine (O(Cout) math) ----
    # Note: the pointwise bias b_pw cancels exactly under training-mode BN
    # (it only shifts the batch mean), so it never has to enter the kernels.
    del b_pw
    cnt = jnp.float32(N * HW)
    s = sums[:, :, 0].sum(axis=0).reshape(P, Cout).sum(axis=0)     # (Cout,)
    ss = sumsqs[:, :, 0].sum(axis=0).reshape(P, Cout).sum(axis=0)  # (Cout,)
    mean = s / cnt
    var = jnp.maximum(ss / cnt - mean * mean, 0.0)
    scale = gamma.astype(f32) * lax.rsqrt(var + eps)               # (Cout,)
    shift = beta.astype(f32) - mean * scale
    wpw_s = wpw * scale[:, None]                                   # fold scale into 1x1 weights
    shift_p = jnp.tile(shift, P).reshape(PCout, 1)

    # ---- pass 2: recompute conv, apply affine, write final output ----
    apply_kernel = functools.partial(_apply_kernel, W=W, HW=HW, P=P,
                                     Cin=Cin, Cout=Cout)
    out = pl.pallas_call(
        apply_kernel,
        grid=(NSTEP,),
        in_specs=[
            pl.BlockSpec((NB, PCin, HW), lambda i: (i, 0, 0)),
            pl.BlockSpec((PCin, 9), lambda i: (0, 0)),
            pl.BlockSpec((Cout, Cin), lambda i: (0, 0)),
            pl.BlockSpec((PCout, 1), lambda i: (0, 0)),
            pl.BlockSpec((2, HW), lambda i: (0, 0)),
            pl.BlockSpec((2, HW), lambda i: (0, 0)),
        ],
        out_specs=pl.BlockSpec((NB, PCout, HW), lambda i: (i, 0, 0)),
        out_shape=jax.ShapeDtypeStruct((G, PCout, HW), f32),
        compiler_params=pltpu.CompilerParams(
            dimension_semantics=("parallel",),
        ),
    )(x_flat, wdw, wpw_s, shift_p, rowm, colm)

    # (G, P*Cout, HW) is contiguous in (N, Cout, H, W) order -> free reshape.
    return out.reshape(N, Cout, H, W)


def _reference(x, w_dw, w_pw, b_pw, gamma, beta, eps=1e-5):
    """Pure-JAX NCHW reference mirroring the PyTorch module (training-mode BN)."""
    dn = ('NCHW', 'OIHW', 'NCHW')
    Cin = x.shape[1]
    y = lax.conv_general_dilated(x, w_dw, (1, 1), ((1, 1), (1, 1)),
                                 dimension_numbers=dn, feature_group_count=Cin)
    y = lax.conv_general_dilated(y, w_pw, (1, 1), ((0, 0), (0, 0)),
                                 dimension_numbers=dn)
    y = y + b_pw[None, :, None, None]
    mean = y.mean(axis=(0, 2, 3), keepdims=True)
    var = ((y - mean) ** 2).mean(axis=(0, 2, 3), keepdims=True)
    return ((y - mean) / jnp.sqrt(var + eps) * gamma[None, :, None, None]
            + beta[None, :, None, None])


if __name__ == "__main__":
    N, Cin, Cout, H, W = 2, 4, 8, 16, 16

    key = jax.random.PRNGKey(0)
    kx, kdw, kpw, kb, kg, kbt = jax.random.split(key, 6)

    x = jax.random.normal(kx, (N, Cin, H, W), jnp.float32)
    w_dw = 0.2 * jax.random.normal(kdw, (Cin, 1, 3, 3), jnp.float32)  # depthwise
    w_pw = 0.2 * jax.random.normal(kpw, (Cout, Cin, 1, 1), jnp.float32)
    b_pw = 0.1 * jax.random.normal(kb, (Cout,), jnp.float32)
    gamma = 1.0 + 0.1 * jax.random.normal(kg, (Cout,), jnp.float32)
    beta = 0.1 * jax.random.normal(kbt, (Cout,), jnp.float32)

    out = separable_conv_block(x, w_dw, w_pw, b_pw, gamma, beta)
    out = jax.block_until_ready(out)

    ref = _reference(x, w_dw, w_pw, b_pw, gamma, beta)
    assert out.shape == (N, Cout, H, W)
    err = float(jnp.max(jnp.abs(out - ref)))
    assert bool(jnp.allclose(out, ref, atol=1e-2, rtol=1e-2)), (
        "mismatch vs reference; max abs err = %e" % err)

    print("KERNEL_OK")
</pallas_src>

<mosaic_0001>
module attributes {stable_mosaic.version = 11 : i64} {
  func.func @_stats_kernel(%arg0: i32, %arg1: memref<1x8x256xf32, #tpu.memory_space<vmem>>, %arg2: memref<8x9xf32, #tpu.memory_space<vmem>>, %arg3: memref<8x4xf32, #tpu.memory_space<vmem>>, %arg4: memref<2x256xf32, #tpu.memory_space<vmem>>, %arg5: memref<2x256xf32, #tpu.memory_space<vmem>>, %arg6: memref<1x16x1xf32, #tpu.memory_space<vmem>>, %arg7: memref<1x16x1xf32, #tpu.memory_space<vmem>>) attributes {dimension_semantics = [#tpu.dimension_semantics<parallel>], iteration_bounds = array<i64: 1>, scalar_prefetch = 0 : i64, scratch_operands = 0 : i64, tpu.core_type = #tpu.core_type<tc>, window_params = [{transform_indices = @transform_0, window_bounds = array<i64: 1, 8, 256>}, {pipeline_mode = #tpu.pipeline_mode<synchronous>, transform_indices = @transform_1, window_bounds = array<i64: 8, 9>}, {pipeline_mode = #tpu.pipeline_mode<synchronous>, transform_indices = @transform_2, window_bounds = array<i64: 8, 4>}, {pipeline_mode = #tpu.pipeline_mode<synchronous>, transform_indices = @transform_3, window_bounds = array<i64: 2, 256>}, {pipeline_mode = #tpu.pipeline_mode<synchronous>, transform_indices = @transform_4, window_bounds = array<i64: 2, 256>}, {transform_indices = @transform_5, window_bounds = array<i64: 1, 16, 1>}, {transform_indices = @transform_6, window_bounds = array<i64: 1, 16, 1>}]} {
    %c0 = arith.constant 0 : index
    %c0_0 = arith.constant 0 : index
    %c0_1 = arith.constant 0 : index
    %0 = vector.load %arg1[%c0, %c0_0, %c0_1] : memref<1x8x256xf32, #tpu.memory_space<vmem>>, vector<1x8x256xf32>
    %c0_2 = arith.constant 0 : index
    %c0_3 = arith.constant 0 : index
    %1 = vector.load %arg2[%c0_2, %c0_3] : memref<8x9xf32, #tpu.memory_space<vmem>>, vector<8x9xf32>
    %c0_4 = arith.constant 0 : index
    %c0_5 = arith.constant 0 : index
    %2 = vector.load %arg3[%c0_4, %c0_5] : memref<8x4xf32, #tpu.memory_space<vmem>>, vector<8x4xf32>
    %c0_6 = arith.constant 0 : index
    %c0_7 = arith.constant 0 : index
    %3 = vector.load %arg4[%c0_6, %c0_7] : memref<2x256xf32, #tpu.memory_space<vmem>>, vector<2x256xf32>
    %c0_8 = arith.constant 0 : index
    %c0_9 = arith.constant 0 : index
    %4 = vector.load %arg5[%c0_8, %c0_9] : memref<2x256xf32, #tpu.memory_space<vmem>>, vector<2x256xf32>
    %5 = vector.extract_strided_slice %0 {offsets = [0, 0, 240], sizes = [1, 8, 16], strides = [1, 1, 1]} : vector<1x8x256xf32> to vector<1x8x16xf32>
    %6 = vector.extract_strided_slice %0 {offsets = [0, 0, 0], sizes = [1, 8, 240], strides = [1, 1, 1]} : vector<1x8x256xf32> to vector<1x8x240xf32>
    %7 = tpu.concatenate %5, %6 in 2 : vector<1x8x16xf32>, vector<1x8x240xf32> -> vector<1x8x256xf32>
    %8 = vector.extract_strided_slice %3 {offsets = [0, 0], sizes = [1, 256], strides = [1, 1]} : vector<2x256xf32> to vector<1x256xf32>
    %9 = vector.shape_cast %8 : vector<1x256xf32> to vector<1x1x256xf32>
    %10 = vector.broadcast %9 : vector<1x1x256xf32> to vector<1x8x256xf32>
    %11 = arith.mulf %7, %10 : vector<1x8x256xf32>
    %12 = vector.extract_strided_slice %0 {offsets = [0, 0, 16], sizes = [1, 8, 240], strides = [1, 1, 1]} : vector<1x8x256xf32> to vector<1x8x240xf32>
    %13 = vector.extract_strided_slice %0 {offsets = [0, 0, 0], sizes = [1, 8, 16], strides = [1, 1, 1]} : vector<1x8x256xf32> to vector<1x8x16xf32>
    %14 = tpu.concatenate %12, %13 in 2 : vector<1x8x240xf32>, vector<1x8x16xf32> -> vector<1x8x256xf32>
    %15 = vector.extract_strided_slice %3 {offsets = [1, 0], sizes = [1, 256], strides = [1, 1]} : vector<2x256xf32> to vector<1x256xf32>
    %16 = vector.shape_cast %15 : vector<1x256xf32> to vector<1x1x256xf32>
    %17 = vector.broadcast %16 : vector<1x1x256xf32> to vector<1x8x256xf32>
    %18 = arith.mulf %14, %17 : vector<1x8x256xf32>
    %19 = vector.extract_strided_slice %1 {offsets = [0, 0], sizes = [8, 1], strides = [1, 1]} : vector<8x9xf32> to vector<8x1xf32>
    %20 = vector.shape_cast %19 : vector<8x1xf32> to vector<1x8x1xf32>
    %21 = vector.broadcast %20 : vector<1x8x1xf32> to vector<1x8x256xf32>
    %22 = arith.mulf %11, %21 : vector<1x8x256xf32>
    %23 = vector.extract_strided_slice %1 {offsets = [0, 3], sizes = [8, 1], strides = [1, 1]} : vector<8x9xf32> to vector<8x1xf32>
    %24 = vector.shape_cast %23 : vector<8x1xf32> to vector<1x8x1xf32>
    %25 = vector.broadcast %24 : vector<1x8x1xf32> to vector<1x8x256xf32>
    %26 = arith.mulf %0, %25 : vector<1x8x256xf32>
    %27 = arith.addf %22, %26 : vector<1x8x256xf32>
    %28 = vector.extract_strided_slice %1 {offsets = [0, 6], sizes = [8, 1], strides = [1, 1]} : vector<8x9xf32> to vector<8x1xf32>
    %29 = vector.shape_cast %28 : vector<8x1xf32> to vector<1x8x1xf32>
    %30 = vector.broadcast %29 : vector<1x8x1xf32> to vector<1x8x256xf32>
    %31 = arith.mulf %18, %30 : vector<1x8x256xf32>
    %32 = arith.addf %27, %31 : vector<1x8x256xf32>
    %33 = vector.extract_strided_slice %1 {offsets = [0, 1], sizes = [8, 1], strides = [1, 1]} : vector<8x9xf32> to vector<8x1xf32>
    %34 = vector.shape_cast %33 : vector<8x1xf32> to vector<1x8x1xf32>
    %35 = vector.broadcast %34 : vector<1x8x1xf32> to vector<1x8x256xf32>
    %36 = arith.mulf %11, %35 : vector<1x8x256xf32>
    %37 = vector.extract_strided_slice %1 {offsets = [0, 4], sizes = [8, 1], strides = [1, 1]} : vector<8x9xf32> to vector<8x1xf32>
    %38 = vector.shape_cast %37 : vector<8x1xf32> to vector<1x8x1xf32>
    %39 = vector.broadcast %38 : vector<1x8x1xf32> to vector<1x8x256xf32>
    %40 = arith.mulf %0, %39 : vector<1x8x256xf32>
    %41 = arith.addf %36, %40 : vector<1x8x256xf32>
    %42 = vector.extract_strided_slice %1 {offsets = [0, 7], sizes = [8, 1], strides = [1, 1]} : vector<8x9xf32> to vector<8x1xf32>
    %43 = vector.shape_cast %42 : vector<8x1xf32> to vector<1x8x1xf32>
    %44 = vector.broadcast %43 : vector<1x8x1xf32> to vector<1x8x256xf32>
    %45 = arith.mulf %18, %44 : vector<1x8x256xf32>
    %46 = arith.addf %41, %45 : vector<1x8x256xf32>
    %47 = vector.extract_strided_slice %1 {offsets = [0, 2], sizes = [8, 1], strides = [1, 1]} : vector<8x9xf32> to vector<8x1xf32>
    %48 = vector.shape_cast %47 : vector<8x1xf32> to vector<1x8x1xf32>
    %49 = vector.broadcast %48 : vector<1x8x1xf32> to vector<1x8x256xf32>
    %50 = arith.mulf %11, %49 : vector<1x8x256xf32>
    %51 = vector.extract_strided_slice %1 {offsets = [0, 5], sizes = [8, 1], strides = [1, 1]} : vector<8x9xf32> to vector<8x1xf32>
    %52 = vector.shape_cast %51 : vector<8x1xf32> to vector<1x8x1xf32>
    %53 = vector.broadcast %52 : vector<1x8x1xf32> to vector<1x8x256xf32>
    %54 = arith.mulf %0, %53 : vector<1x8x256xf32>
    %55 = arith.addf %50, %54 : vector<1x8x256xf32>
    %56 = vector.extract_strided_slice %1 {offsets = [0, 8], sizes = [8, 1], strides = [1, 1]} : vector<8x9xf32> to vector<8x1xf32>
    %57 = vector.shape_cast %56 : vector<8x1xf32> to vector<1x8x1xf32>
    %58 = vector.broadcast %57 : vector<1x8x1xf32> to vector<1x8x256xf32>
    %59 = arith.mulf %18, %58 : vector<1x8x256xf32>
    %60 = arith.addf %55, %59 : vector<1x8x256xf32>
    %61 = vector.extract_strided_slice %32 {offsets = [0, 0, 255], sizes = [1, 8, 1], strides = [1, 1, 1]} : vector<1x8x256xf32> to vector<1x8x1xf32>
    %62 = vector.extract_strided_slice %32 {offsets = [0, 0, 0], sizes = [1, 8, 255], strides = [1, 1, 1]} : vector<1x8x256xf32> to vector<1x8x255xf32>
    %63 = tpu.concatenate %61, %62 in 2 : vector<1x8x1xf32>, vector<1x8x255xf32> -> vector<1x8x256xf32>
    %64 = vector.extract_strided_slice %4 {offsets = [0, 0], sizes = [1, 256], strides = [1, 1]} : vector<2x256xf32> to vector<1x256xf32>
    %65 = vector.shape_cast %64 : vector<1x256xf32> to vector<1x1x256xf32>
    %66 = vector.broadcast %65 : vector<1x1x256xf32> to vector<1x8x256xf32>
    %67 = arith.mulf %63, %66 : vector<1x8x256xf32>
    %68 = arith.addf %46, %67 : vector<1x8x256xf32>
    %69 = vector.extract_strided_slice %60 {offsets = [0, 0, 1], sizes = [1, 8, 255], strides = [1, 1, 1]} : vector<1x8x256xf32> to vector<1x8x255xf32>
    %70 = vector.extract_strided_slice %60 {offsets = [0, 0, 0], sizes = [1, 8, 1], strides = [1, 1, 1]} : vector<1x8x256xf32> to vector<1x8x1xf32>
    %71 = tpu.concatenate %69, %70 in 2 : vector<1x8x255xf32>, vector<1x8x1xf32> -> vector<1x8x256xf32>
    %72 = vector.extract_strided_slice %4 {offsets = [1, 0], sizes = [1, 256], strides = [1, 1]} : vector<2x256xf32> to vector<1x256xf32>
    %73 = vector.shape_cast %72 : vector<1x256xf32> to vector<1x1x256xf32>
    %74 = vector.broadcast %73 : vector<1x1x256xf32> to vector<1x8x256xf32>
    %75 = arith.mulf %71, %74 : vector<1x8x256xf32>
    %76 = arith.addf %68, %75 : vector<1x8x256xf32>
    %77 = vector.extract_strided_slice %76 {offsets = [0, 0, 0], sizes = [1, 1, 256], strides = [1, 1, 1]} : vector<1x8x256xf32> to vector<1x1x256xf32>
    %78 = vector.extract_strided_slice %2 {offsets = [0, 0], sizes = [8, 1], strides = [1, 1]} : vector<8x4xf32> to vector<8x1xf32>
    %79 = vector.shape_cast %78 : vector<8x1xf32> to vector<1x8x1xf32>
    %80 = vector.broadcast %77 : vector<1x1x256xf32> to vector<1x8x256xf32>
    %81 = vector.broadcast %79 : vector<1x8x1xf32> to vector<1x8x256xf32>
    %82 = arith.mulf %80, %81 : vector<1x8x256xf32>
    %83 = vector.extract_strided_slice %76 {offsets = [0, 1, 0], sizes = [1, 1, 256], strides = [1, 1, 1]} : vector<1x8x256xf32> to vector<1x1x256xf32>
    %84 = vector.extract_strided_slice %2 {offsets = [0, 1], sizes = [8, 1], strides = [1, 1]} : vector<8x4xf32> to vector<8x1xf32>
    %85 = vector.shape_cast %84 : vector<8x1xf32> to vector<1x8x1xf32>
    %86 = vector.broadcast %83 : vector<1x1x256xf32> to vector<1x8x256xf32>
    %87 = vector.broadcast %85 : vector<1x8x1xf32> to vector<1x8x256xf32>
    %88 = arith.mulf %86, %87 : vector<1x8x256xf32>
    %89 = arith.addf %82, %88 : vector<1x8x256xf32>
    %90 = vector.extract_strided_slice %76 {offsets = [0, 2, 0], sizes = [1, 1, 256], strides = [1, 1, 1]} : vector<1x8x256xf32> to vector<1x1x256xf32>
    %91 = vector.extract_strided_slice %2 {offsets = [0, 2], sizes = [8, 1], strides = [1, 1]} : vector<8x4xf32> to vector<8x1xf32>
    %92 = vector.shape_cast %91 : vector<8x1xf32> to vector<1x8x1xf32>
    %93 = vector.broadcast %90 : vector<1x1x256xf32> to vector<1x8x256xf32>
    %94 = vector.broadcast %92 : vector<1x8x1xf32> to vector<1x8x256xf32>
    %95 = arith.mulf %93, %94 : vector<1x8x256xf32>
    %96 = arith.addf %89, %95 : vector<1x8x256xf32>
    %97 = vector.extract_strided_slice %76 {offsets = [0, 3, 0], sizes = [1, 1, 256], strides = [1, 1, 1]} : vector<1x8x256xf32> to vector<1x1x256xf32>
    %98 = vector.extract_strided_slice %2 {offsets = [0, 3], sizes = [8, 1], strides = [1, 1]} : vector<8x4xf32> to vector<8x1xf32>
    %99 = vector.shape_cast %98 : vector<8x1xf32> to vector<1x8x1xf32>
    %100 = vector.broadcast %97 : vector<1x1x256xf32> to vector<1x8x256xf32>
    %101 = vector.broadcast %99 : vector<1x8x1xf32> to vector<1x8x256xf32>
    %102 = arith.mulf %100, %101 : vector<1x8x256xf32>
    %103 = arith.addf %96, %102 : vector<1x8x256xf32>
    %104 = vector.extract_strided_slice %76 {offsets = [0, 4, 0], sizes = [1, 1, 256], strides = [1, 1, 1]} : vector<1x8x256xf32> to vector<1x1x256xf32>
    %105 = vector.extract_strided_slice %2 {offsets = [0, 0], sizes = [8, 1], strides = [1, 1]} : vector<8x4xf32> to vector<8x1xf32>
    %106 = vector.shape_cast %105 : vector<8x1xf32> to vector<1x8x1xf32>
    %107 = vector.broadcast %104 : vector<1x1x256xf32> to vector<1x8x256xf32>
    %108 = vector.broadcast %106 : vector<1x8x1xf32> to vector<1x8x256xf32>
    %109 = arith.mulf %107, %108 : vector<1x8x256xf32>
    %110 = vector.extract_strided_slice %76 {offsets = [0, 5, 0], sizes = [1, 1, 256], strides = [1, 1, 1]} : vector<1x8x256xf32> to vector<1x1x256xf32>
    %111 = vector.extract_strided_slice %2 {offsets = [0, 1], sizes = [8, 1], strides = [1, 1]} : vector<8x4xf32> to vector<8x1xf32>
    %112 = vector.shape_cast %111 : vector<8x1xf32> to vector<1x8x1xf32>
    %113 = vector.broadcast %110 : vector<1x1x256xf32> to vector<1x8x256xf32>
    %114 = vector.broadcast %112 : vector<1x8x1xf32> to vector<1x8x256xf32>
    %115 = arith.mulf %113, %114 : vector<1x8x256xf32>
    %116 = arith.addf %109, %115 : vector<1x8x256xf32>
    %117 = vector.extract_strided_slice %76 {offsets = [0, 6, 0], sizes = [1, 1, 256], strides = [1, 1, 1]} : vector<1x8x256xf32> to vector<1x1x256xf32>
    %118 = vector.extract_strided_slice %2 {offsets = [0, 2], sizes = [8, 1], strides = [1, 1]} : vector<8x4xf32> to vector<8x1xf32>
    %119 = vector.shape_cast %118 : vector<8x1xf32> to vector<1x8x1xf32>
    %120 = vector.broadcast %117 : vector<1x1x256xf32> to vector<1x8x256xf32>
    %121 = vector.broadcast %119 : vector<1x8x1xf32> to vector<1x8x256xf32>
    %122 = arith.mulf %120, %121 : vector<1x8x256xf32>
    %123 = arith.addf %116, %122 : vector<1x8x256xf32>
    %124 = vector.extract_strided_slice %76 {offsets = [0, 7, 0], sizes = [1, 1, 256], strides = [1, 1, 1]} : vector<1x8x256xf32> to vector<1x1x256xf32>
    %125 = vector.extract_strided_slice %2 {offsets = [0, 3], sizes = [8, 1], strides = [1, 1]} : vector<8x4xf32> to vector<8x1xf32>
    %126 = vector.shape_cast %125 : vector<8x1xf32> to vector<1x8x1xf32>
    %127 = vector.broadcast %124 : vector<1x1x256xf32> to vector<1x8x256xf32>
    %128 = vector.broadcast %126 : vector<1x8x1xf32> to vector<1x8x256xf32>
    %129 = arith.mulf %127, %128 : vector<1x8x256xf32>
    %130 = arith.addf %123, %129 : vector<1x8x256xf32>
    %131 = tpu.concatenate %103, %130 in 1 : vector<1x8x256xf32>, vector<1x8x256xf32> -> vector<1x16x256xf32>
    %cst = arith.constant dense<0.000000e+00> : vector<1x16xf32>
    %132 = vector.multi_reduction <add>, %131, %cst [2] : vector<1x16x256xf32> to vector<1x16xf32>
    %133 = vector.shape_cast %132 : vector<1x16xf32> to vector<1x16x1xf32>
    %cst_10 = arith.constant dense<0.000000e+00> : vector<16x1xf32>
    %134 = vector.multi_reduction <add>, %133, %cst_10 [0] : vector<1x16x1xf32> to vector<16x1xf32>
    %135 = vector.shape_cast %134 : vector<16x1xf32> to vector<1x16x1xf32>
    %c0_11 = arith.constant 0 : index
    %c0_12 = arith.constant 0 : index
    %c0_13 = arith.constant 0 : index
    %136 = vector.load %arg6[%c0_11, %c0_12, %c0_13] : memref<1x16x1xf32, #tpu.memory_space<vmem>>, vector<1x16x1xf32>
    tpu.vector_store %arg6[%c0_11, %c0_12, %c0_13], %135 {strides = array<i32>} : memref<1x16x1xf32, #tpu.memory_space<vmem>>, vector<1x16x1xf32>,
    %137 = arith.mulf %131, %131 : vector<1x16x256xf32>
    %cst_14 = arith.constant dense<0.000000e+00> : vector<1x16xf32>
    %138 = vector.multi_reduction <add>, %137, %cst_14 [2] : vector<1x16x256xf32> to vector<1x16xf32>
    %139 = vector.shape_cast %138 : vector<1x16xf32> to vector<1x16x1xf32>
    %cst_15 = arith.constant dense<0.000000e+00> : vector<16x1xf32>
    %140 = vector.multi_reduction <add>, %139, %cst_15 [0] : vector<1x16x1xf32> to vector<16x1xf32>
    %141 = vector.shape_cast %140 : vector<16x1xf32> to vector<1x16x1xf32>
    %c0_16 = arith.constant 0 : index
    %c0_17 = arith.constant 0 : index
    %c0_18 = arith.constant 0 : index
    %142 = vector.load %arg7[%c0_16, %c0_17, %c0_18] : memref<1x16x1xf32, #tpu.memory_space<vmem>>, vector<1x16x1xf32>
    tpu.vector_store %arg7[%c0_16, %c0_17, %c0_18], %141 {strides = array<i32>} : memref<1x16x1xf32, #tpu.memory_space<vmem>>, vector<1x16x1xf32>,
    return
  }
  func.func @transform_0(%arg0: i32) -> (i32, i32, i32) {
    %c0_i32 = arith.constant 0 : i32
    %c0_i32_0 = arith.constant 0 : i32
    %c0_i32_1 = arith.constant 0 : i32
    return %arg0, %c0_i32, %c0_i32_0 : i32, i32, i32
  }
  func.func @transform_1(%arg0: i32) -> (i32, i32) {
    %c0_i32 = arith.constant 0 : i32
    %c0_i32_0 = arith.constant 0 : i32
    %c0_i32_1 = arith.constant 0 : i32
    return %c0_i32, %c0_i32_0 : i32, i32
  }
  func.func @transform_2(%arg0: i32) -> (i32, i32) {
    %c0_i32 = arith.constant 0 : i32
    %c0_i32_0 = arith.constant 0 : i32
    %c0_i32_1 = arith.constant 0 : i32
    return %c0_i32, %c0_i32_0 : i32, i32
  }
  func.func @transform_3(%arg0: i32) -> (i32, i32) {
    %c0_i32 = arith.constant 0 : i32
    %c0_i32_0 = arith.constant 0 : i32
    %c0_i32_1 = arith.constant 0 : i32
    return %c0_i32, %c0_i32_0 : i32, i32
  }
  func.func @transform_4(%arg0: i32) -> (i32, i32) {
    %c0_i32 = arith.constant 0 : i32
    %c0_i32_0 = arith.constant 0 : i32
    %c0_i32_1 = arith.constant 0 : i32
    return %c0_i32, %c0_i32_0 : i32, i32
  }
  func.func @transform_5(%arg0: i32) -> (i32, i32, i32) {
    %c0_i32 = arith.constant 0 : i32
    %c0_i32_0 = arith.constant 0 : i32
    %c0_i32_1 = arith.constant 0 : i32
    return %arg0, %c0_i32, %c0_i32_0 : i32, i32, i32
  }
  func.func @transform_6(%arg0: i32) -> (i32, i32, i32) {
    %c0_i32 = arith.constant 0 : i32
    %c0_i32_0 = arith.constant 0 : i32
    %c0_i32_1 = arith.constant 0 : i32
    return %arg0, %c0_i32, %c0_i32_0 : i32, i32, i32
  }
}

module attributes {stable_mosaic.version = 11 : i64} {
  func.func @_apply_kernel(%arg0: i32, %arg1: memref<1x8x256xf32, #tpu.memory_space<vmem>>, %arg2: memref<8x9xf32, #tpu.memory_space<vmem>>, %arg3: memref<8x4xf32, #tpu.memory_space<vmem>>, %arg4: memref<16x1xf32, #tpu.memory_space<vmem>>, %arg5: memref<2x256xf32, #tpu.memory_space<vmem>>, %arg6: memref<2x256xf32, #tpu.memory_space<vmem>>, %arg7: memref<1x16x256xf32, #tpu.memory_space<vmem>>) attributes {dimension_semantics = [#tpu.dimension_semantics<parallel>], iteration_bounds = array<i64: 1>, scalar_prefetch = 0 : i64, scratch_operands = 0 : i64, tpu.core_type = #tpu.core_type<tc>, window_params = [{transform_indices = @transform_0, window_bounds = array<i64: 1, 8, 256>}, {pipeline_mode = #tpu.pipeline_mode<synchronous>, transform_indices = @transform_1, window_bounds = array<i64: 8, 9>}, {pipeline_mode = #tpu.pipeline_mode<synchronous>, transform_indices = @transform_2, window_bounds = array<i64: 8, 4>}, {pipeline_mode = #tpu.pipeline_mode<synchronous>, transform_indices = @transform_3, window_bounds = array<i64: 16, 1>}, {pipeline_mode = #tpu.pipeline_mode<synchronous>, transform_indices = @transform_4, window_bounds = array<i64: 2, 256>}, {pipeline_mode = #tpu.pipeline_mode<synchronous>, transform_indices = @transform_5, window_bounds = array<i64: 2, 256>}, {transform_indices = @transform_6, window_bounds = array<i64: 1, 16, 256>}]} {
    %c0 = arith.constant 0 : index
    %c0_0 = arith.constant 0 : index
    %c0_1 = arith.constant 0 : index
    %0 = vector.load %arg1[%c0, %c0_0, %c0_1] : memref<1x8x256xf32, #tpu.memory_space<vmem>>, vector<1x8x256xf32>
    %c0_2 = arith.constant 0 : index
    %c0_3 = arith.constant 0 : index
    %1 = vector.load %arg2[%c0_2, %c0_3] : memref<8x9xf32, #tpu.memory_space<vmem>>, vector<8x9xf32>
    %c0_4 = arith.constant 0 : index
    %c0_5 = arith.constant 0 : index
    %2 = vector.load %arg3[%c0_4, %c0_5] : memref<8x4xf32, #tpu.memory_space<vmem>>, vector<8x4xf32>
    %c0_6 = arith.constant 0 : index
    %c0_7 = arith.constant 0 : index
    %3 = vector.load %arg5[%c0_6, %c0_7] : memref<2x256xf32, #tpu.memory_space<vmem>>, vector<2x256xf32>
    %c0_8 = arith.constant 0 : index
    %c0_9 = arith.constant 0 : index
    %4 = vector.load %arg6[%c0_8, %c0_9] : memref<2x256xf32, #tpu.memory_space<vmem>>, vector<2x256xf32>
    %5 = vector.extract_strided_slice %0 {offsets = [0, 0, 240], sizes = [1, 8, 16], strides = [1, 1, 1]} : vector<1x8x256xf32> to vector<1x8x16xf32>
    %6 = vector.extract_strided_slice %0 {offsets = [0, 0, 0], sizes = [1, 8, 240], strides = [1, 1, 1]} : vector<1x8x256xf32> to vector<1x8x240xf32>
    %7 = tpu.concatenate %5, %6 in 2 : vector<1x8x16xf32>, vector<1x8x240xf32> -> vector<1x8x256xf32>
    %8 = vector.extract_strided_slice %3 {offsets = [0, 0], sizes = [1, 256], strides = [1, 1]} : vector<2x256xf32> to vector<1x256xf32>
    %9 = vector.shape_cast %8 : vector<1x256xf32> to vector<1x1x256xf32>
    %10 = vector.broadcast %9 : vector<1x1x256xf32> to vector<1x8x256xf32>
    %11 = arith.mulf %7, %10 : vector<1x8x256xf32>
    %12 = vector.extract_strided_slice %0 {offsets = [0, 0, 16], sizes = [1, 8, 240], strides = [1, 1, 1]} : vector<1x8x256xf32> to vector<1x8x240xf32>
    %13 = vector.extract_strided_slice %0 {offsets = [0, 0, 0], sizes = [1, 8, 16], strides = [1, 1, 1]} : vector<1x8x256xf32> to vector<1x8x16xf32>
    %14 = tpu.concatenate %12, %13 in 2 : vector<1x8x240xf32>, vector<1x8x16xf32> -> vector<1x8x256xf32>
    %15 = vector.extract_strided_slice %3 {offsets = [1, 0], sizes = [1, 256], strides = [1, 1]} : vector<2x256xf32> to vector<1x256xf32>
    %16 = vector.shape_cast %15 : vector<1x256xf32> to vector<1x1x256xf32>
    %17 = vector.broadcast %16 : vector<1x1x256xf32> to vector<1x8x256xf32>
    %18 = arith.mulf %14, %17 : vector<1x8x256xf32>
    %19 = vector.extract_strided_slice %1 {offsets = [0, 0], sizes = [8, 1], strides = [1, 1]} : vector<8x9xf32> to vector<8x1xf32>
    %20 = vector.shape_cast %19 : vector<8x1xf32> to vector<1x8x1xf32>
    %21 = vector.broadcast %20 : vector<1x8x1xf32> to vector<1x8x256xf32>
    %22 = arith.mulf %11, %21 : vector<1x8x256xf32>
    %23 = vector.extract_strided_slice %1 {offsets = [0, 3], sizes = [8, 1], strides = [1, 1]} : vector<8x9xf32> to vector<8x1xf32>
    %24 = vector.shape_cast %23 : vector<8x1xf32> to vector<1x8x1xf32>
    %25 = vector.broadcast %24 : vector<1x8x1xf32> to vector<1x8x256xf32>
    %26 = arith.mulf %0, %25 : vector<1x8x256xf32>
    %27 = arith.addf %22, %26 : vector<1x8x256xf32>
    %28 = vector.extract_strided_slice %1 {offsets = [0, 6], sizes = [8, 1], strides = [1, 1]} : vector<8x9xf32> to vector<8x1xf32>
    %29 = vector.shape_cast %28 : vector<8x1xf32> to vector<1x8x1xf32>
    %30 = vector.broadcast %29 : vector<1x8x1xf32> to vector<1x8x256xf32>
    %31 = arith.mulf %18, %30 : vector<1x8x256xf32>
    %32 = arith.addf %27, %31 : vector<1x8x256xf32>
    %33 = vector.extract_strided_slice %1 {offsets = [0, 1], sizes = [8, 1], strides = [1, 1]} : vector<8x9xf32> to vector<8x1xf32>
    %34 = vector.shape_cast %33 : vector<8x1xf32> to vector<1x8x1xf32>
    %35 = vector.broadcast %34 : vector<1x8x1xf32> to vector<1x8x256xf32>
    %36 = arith.mulf %11, %35 : vector<1x8x256xf32>
    %37 = vector.extract_strided_slice %1 {offsets = [0, 4], sizes = [8, 1], strides = [1, 1]} : vector<8x9xf32> to vector<8x1xf32>
    %38 = vector.shape_cast %37 : vector<8x1xf32> to vector<1x8x1xf32>
    %39 = vector.broadcast %38 : vector<1x8x1xf32> to vector<1x8x256xf32>
    %40 = arith.mulf %0, %39 : vector<1x8x256xf32>
    %41 = arith.addf %36, %40 : vector<1x8x256xf32>
    %42 = vector.extract_strided_slice %1 {offsets = [0, 7], sizes = [8, 1], strides = [1, 1]} : vector<8x9xf32> to vector<8x1xf32>
    %43 = vector.shape_cast %42 : vector<8x1xf32> to vector<1x8x1xf32>
    %44 = vector.broadcast %43 : vector<1x8x1xf32> to vector<1x8x256xf32>
    %45 = arith.mulf %18, %44 : vector<1x8x256xf32>
    %46 = arith.addf %41, %45 : vector<1x8x256xf32>
    %47 = vector.extract_strided_slice %1 {offsets = [0, 2], sizes = [8, 1], strides = [1, 1]} : vector<8x9xf32> to vector<8x1xf32>
    %48 = vector.shape_cast %47 : vector<8x1xf32> to vector<1x8x1xf32>
    %49 = vector.broadcast %48 : vector<1x8x1xf32> to vector<1x8x256xf32>
    %50 = arith.mulf %11, %49 : vector<1x8x256xf32>
    %51 = vector.extract_strided_slice %1 {offsets = [0, 5], sizes = [8, 1], strides = [1, 1]} : vector<8x9xf32> to vector<8x1xf32>
    %52 = vector.shape_cast %51 : vector<8x1xf32> to vector<1x8x1xf32>
    %53 = vector.broadcast %52 : vector<1x8x1xf32> to vector<1x8x256xf32>
    %54 = arith.mulf %0, %53 : vector<1x8x256xf32>
    %55 = arith.addf %50, %54 : vector<1x8x256xf32>
    %56 = vector.extract_strided_slice %1 {offsets = [0, 8], sizes = [8, 1], strides = [1, 1]} : vector<8x9xf32> to vector<8x1xf32>
    %57 = vector.shape_cast %56 : vector<8x1xf32> to vector<1x8x1xf32>
    %58 = vector.broadcast %57 : vector<1x8x1xf32> to vector<1x8x256xf32>
    %59 = arith.mulf %18, %58 : vector<1x8x256xf32>
    %60 = arith.addf %55, %59 : vector<1x8x256xf32>
    %61 = vector.extract_strided_slice %32 {offsets = [0, 0, 255], sizes = [1, 8, 1], strides = [1, 1, 1]} : vector<1x8x256xf32> to vector<1x8x1xf32>
    %62 = vector.extract_strided_slice %32 {offsets = [0, 0, 0], sizes = [1, 8, 255], strides = [1, 1, 1]} : vector<1x8x256xf32> to vector<1x8x255xf32>
    %63 = tpu.concatenate %61, %62 in 2 : vector<1x8x1xf32>, vector<1x8x255xf32> -> vector<1x8x256xf32>
    %64 = vector.extract_strided_slice %4 {offsets = [0, 0], sizes = [1, 256], strides = [1, 1]} : vector<2x256xf32> to vector<1x256xf32>
    %65 = vector.shape_cast %64 : vector<1x256xf32> to vector<1x1x256xf32>
    %66 = vector.broadcast %65 : vector<1x1x256xf32> to vector<1x8x256xf32>
    %67 = arith.mulf %63, %66 : vector<1x8x256xf32>
    %68 = arith.addf %46, %67 : vector<1x8x256xf32>
    %69 = vector.extract_strided_slice %60 {offsets = [0, 0, 1], sizes = [1, 8, 255], strides = [1, 1, 1]} : vector<1x8x256xf32> to vector<1x8x255xf32>
    %70 = vector.extract_strided_slice %60 {offsets = [0, 0, 0], sizes = [1, 8, 1], strides = [1, 1, 1]} : vector<1x8x256xf32> to vector<1x8x1xf32>
    %71 = tpu.concatenate %69, %70 in 2 : vector<1x8x255xf32>, vector<1x8x1xf32> -> vector<1x8x256xf32>
    %72 = vector.extract_strided_slice %4 {offsets = [1, 0], sizes = [1, 256], strides = [1, 1]} : vector<2x256xf32> to vector<1x256xf32>
    %73 = vector.shape_cast %72 : vector<1x256xf32> to vector<1x1x256xf32>
    %74 = vector.broadcast %73 : vector<1x1x256xf32> to vector<1x8x256xf32>
    %75 = arith.mulf %71, %74 : vector<1x8x256xf32>
    %76 = arith.addf %68, %75 : vector<1x8x256xf32>
    %77 = vector.extract_strided_slice %76 {offsets = [0, 0, 0], sizes = [1, 1, 256], strides = [1, 1, 1]} : vector<1x8x256xf32> to vector<1x1x256xf32>
    %78 = vector.extract_strided_slice %2 {offsets = [0, 0], sizes = [8, 1], strides = [1, 1]} : vector<8x4xf32> to vector<8x1xf32>
    %79 = vector.shape_cast %78 : vector<8x1xf32> to vector<1x8x1xf32>
    %80 = vector.broadcast %77 : vector<1x1x256xf32> to vector<1x8x256xf32>
    %81 = vector.broadcast %79 : vector<1x8x1xf32> to vector<1x8x256xf32>
    %82 = arith.mulf %80, %81 : vector<1x8x256xf32>
    %83 = vector.extract_strided_slice %76 {offsets = [0, 1, 0], sizes = [1, 1, 256], strides = [1, 1, 1]} : vector<1x8x256xf32> to vector<1x1x256xf32>
    %84 = vector.extract_strided_slice %2 {offsets = [0, 1], sizes = [8, 1], strides = [1, 1]} : vector<8x4xf32> to vector<8x1xf32>
    %85 = vector.shape_cast %84 : vector<8x1xf32> to vector<1x8x1xf32>
    %86 = vector.broadcast %83 : vector<1x1x256xf32> to vector<1x8x256xf32>
    %87 = vector.broadcast %85 : vector<1x8x1xf32> to vector<1x8x256xf32>
    %88 = arith.mulf %86, %87 : vector<1x8x256xf32>
    %89 = arith.addf %82, %88 : vector<1x8x256xf32>
    %90 = vector.extract_strided_slice %76 {offsets = [0, 2, 0], sizes = [1, 1, 256], strides = [1, 1, 1]} : vector<1x8x256xf32> to vector<1x1x256xf32>
    %91 = vector.extract_strided_slice %2 {offsets = [0, 2], sizes = [8, 1], strides = [1, 1]} : vector<8x4xf32> to vector<8x1xf32>
    %92 = vector.shape_cast %91 : vector<8x1xf32> to vector<1x8x1xf32>
    %93 = vector.broadcast %90 : vector<1x1x256xf32> to vector<1x8x256xf32>
    %94 = vector.broadcast %92 : vector<1x8x1xf32> to vector<1x8x256xf32>
    %95 = arith.mulf %93, %94 : vector<1x8x256xf32>
    %96 = arith.addf %89, %95 : vector<1x8x256xf32>
    %97 = vector.extract_strided_slice %76 {offsets = [0, 3, 0], sizes = [1, 1, 256], strides = [1, 1, 1]} : vector<1x8x256xf32> to vector<1x1x256xf32>
    %98 = vector.extract_strided_slice %2 {offsets = [0, 3], sizes = [8, 1], strides = [1, 1]} : vector<8x4xf32> to vector<8x1xf32>
    %99 = vector.shape_cast %98 : vector<8x1xf32> to vector<1x8x1xf32>
    %100 = vector.broadcast %97 : vector<1x1x256xf32> to vector<1x8x256xf32>
    %101 = vector.broadcast %99 : vector<1x8x1xf32> to vector<1x8x256xf32>
    %102 = arith.mulf %100, %101 : vector<1x8x256xf32>
    %103 = arith.addf %96, %102 : vector<1x8x256xf32>
    %104 = vector.extract_strided_slice %76 {offsets = [0, 4, 0], sizes = [1, 1, 256], strides = [1, 1, 1]} : vector<1x8x256xf32> to vector<1x1x256xf32>
    %105 = vector.extract_strided_slice %2 {offsets = [0, 0], sizes = [8, 1], strides = [1, 1]} : vector<8x4xf32> to vector<8x1xf32>
    %106 = vector.shape_cast %105 : vector<8x1xf32> to vector<1x8x1xf32>
    %107 = vector.broadcast %104 : vector<1x1x256xf32> to vector<1x8x256xf32>
    %108 = vector.broadcast %106 : vector<1x8x1xf32> to vector<1x8x256xf32>
    %109 = arith.mulf %107, %108 : vector<1x8x256xf32>
    %110 = vector.extract_strided_slice %76 {offsets = [0, 5, 0], sizes = [1, 1, 256], strides = [1, 1, 1]} : vector<1x8x256xf32> to vector<1x1x256xf32>
    %111 = vector.extract_strided_slice %2 {offsets = [0, 1], sizes = [8, 1], strides = [1, 1]} : vector<8x4xf32> to vector<8x1xf32>
    %112 = vector.shape_cast %111 : vector<8x1xf32> to vector<1x8x1xf32>
    %113 = vector.broadcast %110 : vector<1x1x256xf32> to vector<1x8x256xf32>
    %114 = vector.broadcast %112 : vector<1x8x1xf32> to vector<1x8x256xf32>
    %115 = arith.mulf %113, %114 : vector<1x8x256xf32>
    %116 = arith.addf %109, %115 : vector<1x8x256xf32>
    %117 = vector.extract_strided_slice %76 {offsets = [0, 6, 0], sizes = [1, 1, 256], strides = [1, 1, 1]} : vector<1x8x256xf32> to vector<1x1x256xf32>
    %118 = vector.extract_strided_slice %2 {offsets = [0, 2], sizes = [8, 1], strides = [1, 1]} : vector<8x4xf32> to vector<8x1xf32>
    %119 = vector.shape_cast %118 : vector<8x1xf32> to vector<1x8x1xf32>
    %120 = vector.broadcast %117 : vector<1x1x256xf32> to vector<1x8x256xf32>
    %121 = vector.broadcast %119 : vector<1x8x1xf32> to vector<1x8x256xf32>
    %122 = arith.mulf %120, %121 : vector<1x8x256xf32>
    %123 = arith.addf %116, %122 : vector<1x8x256xf32>
    %124 = vector.extract_strided_slice %76 {offsets = [0, 7, 0], sizes = [1, 1, 256], strides = [1, 1, 1]} : vector<1x8x256xf32> to vector<1x1x256xf32>
    %125 = vector.extract_strided_slice %2 {offsets = [0, 3], sizes = [8, 1], strides = [1, 1]} : vector<8x4xf32> to vector<8x1xf32>
    %126 = vector.shape_cast %125 : vector<8x1xf32> to vector<1x8x1xf32>
    %127 = vector.broadcast %124 : vector<1x1x256xf32> to vector<1x8x256xf32>
    %128 = vector.broadcast %126 : vector<1x8x1xf32> to vector<1x8x256xf32>
    %129 = arith.mulf %127, %128 : vector<1x8x256xf32>
    %130 = arith.addf %123, %129 : vector<1x8x256xf32>
    %131 = tpu.concatenate %103, %130 in 1 : vector<1x8x256xf32>, vector<1x8x256xf32> -> vector<1x16x256xf32>
    %c0_10 = arith.constant 0 : index
    %c0_11 = arith.constant 0 : index
    %132 = vector.load %arg4[%c0_10, %c0_11] : memref<16x1xf32, #tpu.memory_space<vmem>>, vector<16x1xf32>
    %133 = vector.shape_cast %132 : vector<16x1xf32> to vector<1x16x1xf32>
    %134 = vector.broadcast %133 : vector<1x16x1xf32> to vector<1x16x256xf32>
    %135 = arith.addf %131, %134 : vector<1x16x256xf32>
    %c0_12 = arith.constant 0 : index
    %c0_13 = arith.constant 0 : index
    %c0_14 = arith.constant 0 : index
    %136 = vector.load %arg7[%c0_12, %c0_13, %c0_14] : memref<1x16x256xf32, #tpu.memory_space<vmem>>, vector<1x16x256xf32>
    tpu.vector_store %arg7[%c0_12, %c0_13, %c0_14], %135 {strides = array<i32>} : memref<1x16x256xf32, #tpu.memory_space<vmem>>, vector<1x16x256xf32>,
    return
  }
  func.func @transform_0(%arg0: i32) -> (i32, i32, i32) {
    %c0_i32 = arith.constant 0 : i32
    %c0_i32_0 = arith.constant 0 : i32
    %c0_i32_1 = arith.constant 0 : i32
    return %arg0, %c0_i32, %c0_i32_0 : i32, i32, i32
  }
  func.func @transform_1(%arg0: i32) -> (i32, i32) {
    %c0_i32 = arith.constant 0 : i32
    %c0_i32_0 = arith.constant 0 : i32
    %c0_i32_1 = arith.constant 0 : i32
    return %c0_i32, %c0_i32_0 : i32, i32
  }
  func.func @transform_2(%arg0: i32) -> (i32, i32) {
    %c0_i32 = arith.constant 0 : i32
    %c0_i32_0 = arith.constant 0 : i32
    %c0_i32_1 = arith.constant 0 : i32
    return %c0_i32, %c0_i32_0 : i32, i32
  }
  func.func @transform_3(%arg0: i32) -> (i32, i32) {
    %c0_i32 = arith.constant 0 : i32
    %c0_i32_0 = arith.constant 0 : i32
    %c0_i32_1 = arith.constant 0 : i32
    return %c0_i32, %c0_i32_0 : i32, i32
  }
  func.func @transform_4(%arg0: i32) -> (i32, i32) {
    %c0_i32 = arith.constant 0 : i32
    %c0_i32_0 = arith.constant 0 : i32
    %c0_i32_1 = arith.constant 0 : i32
    return %c0_i32, %c0_i32_0 : i32, i32
  }
  func.func @transform_5(%arg0: i32) -> (i32, i32) {
    %c0_i32 = arith.constant 0 : i32
    %c0_i32_0 = arith.constant 0 : i32
    %c0_i32_1 = arith.constant 0 : i32
    return %c0_i32, %c0_i32_0 : i32, i32
  }
  func.func @transform_6(%arg0: i32) -> (i32, i32, i32) {
    %c0_i32 = arith.constant 0 : i32
    %c0_i32_0 = arith.constant 0 : i32
    %c0_i32_1 = arith.constant 0 : i32
    return %arg0, %c0_i32, %c0_i32_0 : i32, i32, i32
  }
}

</mosaic_0001>

<bundles_post_ra>
// kernel: tile.16
= control target key start
LH: loop header
LB: loop body
LE: loop exit
PB: predicated region body
PF: predicated region fallthrough
CT: control target
= control target key end

     0   :  { %s22_s0 = inlined_call_operand.vmem [shape: f32[8], index: 0, kind: input, shape index: {}]   ;;  %s23_s1 = inlined_call_operand.vmem [shape: f32[2,8], index: 1, kind: output, shape index: {}]  }
   0x1   :  { %v4_v0 = vld [vmem:[%s22_s0] ss:$0 sm:$0xff] }
   0x2   :  { %5 = vst [vmem:[%s23_s1] sm:$0x3] %v4_v0 }

// kernel: tile.0
= control target key start
LH: loop header
LB: loop body
LE: loop exit
PB: predicated region body
PF: predicated region fallthrough
CT: control target
= control target key end

     0   :  { %s66_s8 = smov 125   ;;  %vm7_vm0 = vcmask 7168   ;;  %s67_s11 = smov 126   ;;  %s117_s0 = inlined_call_operand.vmem [shape: f32[2,8], index: 0, kind: input, shape index: {}]   ;;  %s118_s1 = inlined_call_operand.vmem [shape: f32[16,1], index: 1, kind: output, shape index: {}]  }
   0x1   :  { %v4_v0 = vld [vmem:[%s117_s0] sm:$0x3]  ;;  %s65_s0 = smov 127   ;;  %s68_s12 = smov 124  }
   0x2   :  { %5 = vst [vmem:[#allocation0] sm:$0x3] %v4_v0  ;;  %s69_s13 = smov 123   ;;  %s70_s14 = smov 122  }
   0x3   :  { %s71_s15 = smov 121  }
   0x9   :  { %v9_v1 = vld [vmem:[#allocation0] sm:$0x3]  }
   0xa   :  { %v21_v2 = vld [vmem:[#allocation0] sm:$0x3]   ;;  %10 = vrot.lane.b32.xlu0 %v9_v1, %s65_s0 }
   0xb   :  { %22 = vrot.lane.b32.xlu1 %v21_v2, %s66_s8  ;;  %v15_v3 = vld [vmem:[#allocation0] sm:$0x3]  }
   0xc   :  { %v27_v4 = vld [vmem:[#allocation0] sm:$0x3]  }
   0xd   :  { %v6_v5 = vld [vmem:[#allocation0] sm:$0x3]  }
   0xe   :  { %8 = vst.msk [vmem:[%s118_s1] ss:$8 sm:$0x3] %vm7_vm0, %v6_v5   ;;  %16 = vrot.lane.b32.xlu0 %v15_v3, %s67_s11  ;;  %v33_v6 = vld [vmem:[#allocation0] sm:$0x3]  }
   0xf   :  { %28 = vrot.lane.b32.xlu1 %v27_v4, %s68_s12  ;;  %v39_v7 = vld [vmem:[#allocation0] sm:$0x3]  }
  0x10   :  { %v45_v8 = vld [vmem:[#allocation0] sm:$0x3]  }
  0x12   :  { %34 = vrot.lane.b32.xlu0 %v33_v6, %s69_s13 }
  0x13   :  { %40 = vrot.lane.b32.xlu1 %v39_v7, %s70_s14 }
  0x16   :  { %46 = vrot.lane.b32.xlu0 %v45_v8, %s71_s15 }
  0x7c   :  { %v11_v9 = vpop.permute.xlu0 %10  }
  0x7d   :  { %v23_v10 = vpop.permute.xlu1 %22   ;;  %51 = vst.msk [vmem:[%s118_s1 + $0x1] ss:$8 sm:$0x3] %vm7_vm0, %v11_v9  }
  0x7e   :  { %53 = vst.msk [vmem:[%s118_s1 + $0x3] ss:$8 sm:$0x3] %vm7_vm0, %v23_v10  }
  0x80   :  { %v17_v11 = vpop.permute.xlu0 %16  }
  0x81   :  { %v29_v12 = vpop.permute.xlu1 %28   ;;  %52 = vst.msk [vmem:[%s118_s1 + $0x2] ss:$8 sm:$0x3] %vm7_vm0, %v17_v11  }
  0x82   :  { %54 = vst.msk [vmem:[%s118_s1 + $0x4] ss:$8 sm:$0x3] %vm7_vm0, %v29_v12  }
  0x84   :  { %v35_v13 = vpop.permute.xlu0 %34  }
  0x85   :  { %v41_v14 = vpop.permute.xlu1 %40   ;;  %55 = vst.msk [vmem:[%s118_s1 + $0x5] ss:$8 sm:$0x3] %vm7_vm0, %v35_v13  }
  0x86   :  { %56 = vst.msk [vmem:[%s118_s1 + $0x6] ss:$8 sm:$0x3] %vm7_vm0, %v41_v14  }
  0x88   :  { %v47_v15 = vpop.permute.xlu0 %46  }
  0x89   :  { %57 = vst.msk [vmem:[%s118_s1 + $0x7] ss:$8 sm:$0x3] %vm7_vm0, %v47_v15  }

// kernel: separable_conv_block.2
= control target key start
LH: loop header
LB: loop body
LE: loop exit
PB: predicated region body
PF: predicated region fallthrough
CT: control target
= control target key end

     0   :  { %v394_v0 = vmov 6   ;;  %v395_v1 = vmov 0   ;;  %v396_v3 = vmov 2   ;;  %v397_v4 = vmov 3   ;;  %s399_s25 = smov 16   ;;  %s403_s27 = smov 112   ;;  %s540_s1 = inlined_call_operand.vmem [shape: f32[8,9], index: 1, kind: input, shape index: {}]   ;;  %s541_s0 = inlined_call_operand.vmem [shape: f32[1,8,256], index: 0, kind: input, shape index: {}]   ;;  %s542_s2 = inlined_call_operand.vmem [shape: f32[8,4], index: 2, kind: input, shape index: {}]   ;;  %s543_s3 = inlined_call_operand.vmem [shape: f32[2,256], index: 3, kind: input, shape index: {}]   ;;  %s544_s4 = inlined_call_operand.vmem [shape: f32[2,256], index: 4, kind: input, shape index: {}]   ;;  %s545_s5 = inlined_call_operand.vmem [shape: f32[1,16,1], index: 5, kind: output, shape index: {0}]   ;;  %s546_s6 = inlined_call_operand.vmem [shape: f32[1,16,1], index: 6, kind: output, shape index: {1}]  }
   0x1   :  { %383 = vset.pattern.permute.xlu1 %v394_v0  ;;  %381 = vset.pattern.permute.xlu0 %v395_v1  ;;  %v24_v2 = vld [vmem:[%s540_s1] sm:$0xff]  ;;  %v448_v5 = vld [vmem:[%s541_s0 + $0x8] sm:$0xff]  ;;  %v398_v6 = vmov 5   ;;  %v400_v7 = vmov 8   ;;  %v401_v9 = vmov 4   ;;  %v402_v10 = vmov 1  }
   0x2   :  { %107 = vperm.xlu1 %383, %v24_v2   ;;  %93 = vperm.xlu0 %381, %v24_v2   ;;  %v454_v8 = vld [vmem:[%s541_s0] sm:$0xff]  ;;  %v404_v12 = vmov 7   ;;  %v41_v13 = vlaneseq  ;;  %vm35_vm0 = vcmask 130048   ;;  %vm65_vm1 = vcmask 916480   ;;  %s406_s30 = smov 127  }
   0x3   :  { %v461_v11 = vld [vmem:[%s542_s2] sm:$0xff]  ;;  %vm165_vm2 = vcmask 7168   ;;  %vm199_vm3 = vcmask 1039360  }
   0x4   :  { %v466_v16 = vshrl.u32 %v41_v13, 7  ;;  %v26_v20 = vld [vmem:[%s543_s3] sm:$0xf]  ;;  %s405_s3 = smov 1  }
   0x6   :  { %384 = vset.pattern.permute.xlu1 %v396_v3  ;;  %382 = vset.pattern.permute.xlu0 %v397_v4  ;;  %v469_v18 = vsub.s32 0, %v466_v16  ;;  %v472_v19 = vsub.s32 2, %v466_v16  ;;  %v480_v25 = vsub.s32 1, %v466_v16  ;;  %v483_v26 = vsub.s32 3, %v466_v16 }
   0x7   :  { %137 = vperm.xlu1 %384, %v24_v2   ;;  %99 = vperm.xlu0 %382, %v24_v2  }
   0x8   :  { %v44_v23 = vrot.slane %v26_v20, %v469_v18  ;;  %v48_v24 = vrot.slane %v26_v20, %v472_v19  ;;  %v74_v33 = vrot.slane %v26_v20, %v480_v25  ;;  %v78_v34 = vrot.slane %v26_v20, %v483_v26 }
   0xa   :  { %v54_v28 = vrot.slane %v44_v23, %v469_v18  ;;  %v58_v29 = vrot.slane %v48_v24, %v469_v18  ;;  %v84_v38 = vrot.slane %v74_v33, %v480_v25  ;;  %v88_v39 = vrot.slane %v78_v34, %v480_v25 }
   0xb   :  { %385 = vset.pattern.permute.xlu1 %v398_v6  ;;  %29 = vrot.lane.b32.xlu0 %v448_v5, %s399_s25 }
   0xc   :  { %143 = vperm.xlu1 %385, %v24_v2   ;;  %386 = vset.pattern.permute.xlu0 %v400_v7 }
   0xf   :  { %151 = vperm.xlu0 %386, %v24_v2  }
  0x10   :  { %33 = vrot.lane.b32.xlu1 %v454_v8, %s399_s25 }
  0x11   :  { %388 = vset.pattern.permute.xlu1 %v401_v9 }
  0x13   :  { %387 = vset.pattern.permute.xlu0 %v402_v10 }
  0x14   :  { %115 = vperm.xlu0 %387, %v24_v2   ;;  %61 = vrot.lane.b32.xlu1 %v454_v8, %s403_s27 }
  0x18   :  { %63 = vrot.lane.b32.xlu1 %v448_v5, %s403_s27  ;;  %390 = vset.pattern.permute.xlu0 %v395_v1 }
  0x19   :  { %237 = vperm.xlu0 %390, %v461_v11  }
  0x1c   :  { %121 = vperm.xlu1 %388, %v24_v2  }
  0x1d   :  { %393 = vset.pattern.permute.xlu0 %v397_v4 }
  0x20   :  { %389 = vset.pattern.permute.xlu1 %v404_v12 }
  0x21   :  { %129 = vperm.xlu1 %389, %v24_v2  }
  0x25   :  { %391 = vset.pattern.permute.xlu1 %v402_v10 }
  0x26   :  { %251 = vperm.xlu1 %391, %v461_v11  }
  0x2a   :  { %392 = vset.pattern.permute.xlu1 %v396_v3 }
  0x81   :  { %v108_v14 = vpop.permute.xlu1 %107  ;;  %v94_v15 = vpop.permute.xlu0 %93 }
  0x86   :  { %v138_v17 = vpop.permute.xlu1 %137  ;;  %v100_v21 = vpop.permute.xlu0 %99 }
  0x87   :  { %v102_v41 = vmul.f32 %v100_v21, %v454_v8  ;;  %v103_v42 = vmul.f32 %v100_v21, %v448_v5 }
  0x8a   :  { %v30_v27 = vpop.permute.xlu0 %29 }
  0x8b   :  { %v144_v22 = vpop.permute.xlu1 %143 }
  0x8c   :  { %v146_v57 = vmul.f32 %v144_v22, %v454_v8  ;;  %v147_v58 = vmul.f32 %v144_v22, %v448_v5 }
  0x8e   :  { %v152_v40 = vpop.permute.xlu0 %151 }
  0x8f   :  { %v34_v30 = vpop.permute.xlu1 %33 }
  0x90   :  { %v36_v31 = vsel %vm35_vm0, %v34_v30, %v30_v27  ;;  %v39_v32 = vsel %vm35_vm0, %v30_v27, %v34_v30 }
  0x91   :  { %v59_v35 = vmul.f32 %v54_v28, %v39_v32  ;;  %v60_v36 = vmul.f32 %v58_v29, %v36_v31 }
  0x93   :  { %v62_v37 = vpop.permute.xlu1 %61  ;;  %v96_v43 = vmul.f32 %v94_v15, %v59_v35  ;;  %v97_v44 = vmul.f32 %v94_v15, %v60_v36  ;;  %v140_v50 = vmul.f32 %v138_v17, %v59_v35  ;;  %v141_v51 = vmul.f32 %v138_v17, %v60_v36  ;;  %v116_v59 = vpop.permute.xlu0 %115 }
  0x94   :  { %v118_v4 = vmul.f32 %v116_v59, %v59_v35  ;;  %v119_v6 = vmul.f32 %v116_v59, %v60_v36 }
  0x95   :  { %v105_v53 = vadd.f32 %v103_v42, %v97_v44  ;;  %v104_v55 = vadd.f32 %v102_v41, %v96_v43  ;;  %v148_v2 = vadd.f32 %v146_v57, %v140_v50  ;;  %v149_v3 = vadd.f32 %v147_v58, %v141_v51 }
  0x96   :  { %v314_v57 = vsub.s32 6, %v466_v16  ;;  %v326_v58 = vsub.s32 7, %v466_v16 }
  0x97   :  { %v64_v45 = vpop.permute.xlu1 %63 }
  0x98   :  { %v66_v46 = vsel %vm65_vm1, %v62_v37, %v64_v45  ;;  %v70_v47 = vsel %vm65_vm1, %v64_v45, %v62_v37  ;;  %v238_v20 = vpop.permute.xlu0 %237 }
  0x99   :  { %v89_v48 = vmul.f32 %v84_v38, %v66_v46  ;;  %v90_v49 = vmul.f32 %v88_v39, %v70_v47  ;;  %v292_v47 = vsub.s32 4, %v466_v16 }
  0x9b   :  { %v122_v52 = vpop.permute.xlu1 %121  ;;  %v111_v54 = vmul.f32 %v108_v14, %v90_v49  ;;  %v110_v56 = vmul.f32 %v108_v14, %v89_v48  ;;  %v154_v60 = vmul.f32 %v152_v40, %v89_v48  ;;  %v155_v61 = vmul.f32 %v152_v40, %v90_v49 }
  0x9c   :  { %v124_v62 = vmul.f32 %v122_v52, %v454_v8  ;;  %v125_v63 = vmul.f32 %v122_v52, %v448_v5  ;;  %v27_v5 = vld [vmem:[%s544_s4] sm:$0xf] }
  0x9d   :  { %v113_v0 = vadd.f32 %v111_v54, %v105_v53  ;;  %v112_v1 = vadd.f32 %v110_v56, %v104_v55  ;;  %v156_v9 = vadd.f32 %v154_v60, %v148_v2  ;;  %v157_v10 = vadd.f32 %v155_v61, %v149_v3 }
  0x9e   :  { %v126_v12 = vadd.f32 %v124_v62, %v118_v4  ;;  %v127_v13 = vadd.f32 %v125_v63, %v119_v6  ;;  %v174_v22 = vrot.slane %v27_v5, %v469_v18  ;;  %v178_v23 = vrot.slane %v27_v5, %v472_v19 }
  0x9f   :  { %159 = vrot.lane.b32.xlu0 %v113_v0, %s405_s3  ;;  %163 = vrot.lane.b32.xlu1 %v112_v1, %s405_s3  ;;  %v208_v28 = vrot.slane %v27_v5, %v480_v25  ;;  %v212_v29 = vrot.slane %v27_v5, %v483_v26 }
  0xa0   :  { %v130_v7 = vpop.permute.xlu1 %129  ;;  %v184_v24 = vrot.slane %v174_v22, %v469_v18  ;;  %v188_v27 = vrot.slane %v178_v23, %v469_v18 }
  0xa1   :  { %v132_v14 = vmul.f32 %v130_v7, %v89_v48  ;;  %v133_v15 = vmul.f32 %v130_v7, %v90_v49  ;;  %v218_v35 = vrot.slane %v208_v28, %v480_v25  ;;  %v222_v36 = vrot.slane %v212_v29, %v480_v25 }
  0xa2   :  { %v302_v48 = vsub.s32 5, %v466_v16 }
  0xa3   :  { %v134_v17 = vadd.f32 %v132_v14, %v126_v12  ;;  %v135_v8 = vadd.f32 %v133_v15, %v127_v13  ;;  %195 = vrot.lane.b32.xlu0 %v156_v9, %s406_s30  ;;  %197 = vrot.lane.b32.xlu1 %v157_v10, %s406_s30 }
  0xa5   :  { %v252_v21 = vpop.permute.xlu1 %251 }
  0xa7   :  { %283 = vperm.xlu0 %393, %v461_v11   ;;  %267 = vperm.xlu1 %392, %v461_v11  }
 0x111   :  { %v160_v11 = vpop.permute.xlu0 %159  ;;  %v164_v30 = vpop.permute.xlu1 %163 }
 0x112   :  { %v166_v31 = vsel %vm165_vm2, %v164_v30, %v160_v11  ;;  %v169_v32 = vsel %vm165_vm2, %v160_v11, %v164_v30 }
 0x113   :  { %v189_v33 = vmul.f32 %v184_v24, %v169_v32  ;;  %v190_v34 = vmul.f32 %v188_v27, %v166_v31 }
 0x115   :  { %v196_v37 = vpop.permute.xlu0 %195  ;;  %v198_v38 = vpop.permute.xlu1 %197  ;;  %v191_v41 = vadd.f32 %v189_v33, %v134_v17  ;;  %v192_v42 = vadd.f32 %v190_v34, %v135_v8 }
 0x116   :  { %v200_v39 = vsel %vm199_vm3, %v196_v37, %v198_v38  ;;  %v204_v40 = vsel %vm199_vm3, %v198_v38, %v196_v37 }
 0x117   :  { %v223_v43 = vmul.f32 %v218_v35, %v200_v39  ;;  %v224_v44 = vmul.f32 %v222_v36, %v204_v40 }
 0x119   :  { %v225_v45 = vadd.f32 %v223_v43, %v191_v41  ;;  %v226_v46 = vadd.f32 %v224_v44, %v192_v42 }
 0x11b   :  { %v230_v49 = vrot.slane %v225_v45, %v469_v18  ;;  %v234_v50 = vrot.slane %v226_v46, %v469_v18  ;;  %v245_v51 = vrot.slane %v225_v45, %v480_v25  ;;  %v249_v52 = vrot.slane %v226_v46, %v480_v25 }
 0x11c   :  { %v293_v53 = vrot.slane %v225_v45, %v292_v47  ;;  %v297_v54 = vrot.slane %v226_v46, %v292_v47  ;;  %v303_v55 = vrot.slane %v225_v45, %v302_v48  ;;  %v307_v56 = vrot.slane %v226_v46, %v302_v48 }
 0x11d   :  { %v240_v59 = vmul.f32 %v238_v20, %v230_v49  ;;  %v241_v60 = vmul.f32 %v238_v20, %v234_v50  ;;  %v254_v61 = vmul.f32 %v252_v21, %v245_v51  ;;  %v255_v62 = vmul.f32 %v252_v21, %v249_v52 }
 0x11e   :  { %v298_v63 = vmul.f32 %v293_v53, %v238_v20  ;;  %v299_v0 = vmul.f32 %v297_v54, %v238_v20  ;;  %v308_v1 = vmul.f32 %v303_v55, %v252_v21  ;;  %v309_v18 = vmul.f32 %v307_v56, %v252_v21 }
 0x11f   :  { %v261_v2 = vrot.slane %v225_v45, %v472_v19  ;;  %v265_v25 = vrot.slane %v226_v46, %v472_v19  ;;  %v315_v3 = vrot.slane %v225_v45, %v314_v57  ;;  %v319_v4 = vrot.slane %v226_v46, %v314_v57 }
 0x120   :  { %v256_v6 = vadd.f32 %v254_v61, %v240_v59  ;;  %v257_v7 = vadd.f32 %v255_v62, %v241_v60  ;;  %v277_v9 = vrot.slane %v225_v45, %v483_v26  ;;  %v281_v16 = vrot.slane %v226_v46, %v483_v26 }
 0x121   :  { %v310_v13 = vadd.f32 %v308_v1, %v298_v63  ;;  %v311_v14 = vadd.f32 %v309_v18, %v299_v0  ;;  %v327_v15 = vrot.slane %v225_v45, %v326_v58  ;;  %v331_v17 = vrot.slane %v226_v46, %v326_v58 }
 0x126   :  { %v284_v10 = vpop.permute.xlu0 %283  ;;  %v268_v12 = vpop.permute.xlu1 %267 }
 0x127   :  { %v270_v8 = vmul.f32 %v268_v12, %v261_v2  ;;  %v271_v5 = vmul.f32 %v268_v12, %v265_v25  ;;  %v320_v20 = vmul.f32 %v315_v3, %v268_v12  ;;  %v321_v21 = vmul.f32 %v319_v4, %v268_v12 }
 0x128   :  { %v286_v22 = vmul.f32 %v284_v10, %v277_v9  ;;  %v287_v19 = vmul.f32 %v284_v10, %v281_v16  ;;  %v332_v23 = vmul.f32 %v327_v15, %v284_v10  ;;  %v333_v24 = vmul.f32 %v331_v17, %v284_v10 }
 0x129   :  { %v272_v27 = vadd.f32 %v270_v8, %v256_v6  ;;  %v273_v28 = vadd.f32 %v271_v5, %v257_v7  ;;  %v322_v29 = vadd.f32 %v320_v20, %v310_v13  ;;  %v323_v11 = vadd.f32 %v321_v21, %v311_v14 }
 0x12b   :  { %v288_v30 = vadd.f32 %v286_v22, %v272_v27  ;;  %v289_v26 = vadd.f32 %v287_v19, %v273_v28  ;;  %v334_v31 = vadd.f32 %v332_v23, %v322_v29  ;;  %v335_v32 = vadd.f32 %v333_v24, %v323_v11 }
 0x12d   :  { %v336_v33 = vadd.f32 %v289_v26, %v288_v30  ;;  %v339_v34 = vadd.f32 %v335_v32, %v334_v31  ;;  %v346_v35 = vmul.f32 %v288_v30, %v288_v30  ;;  %v347_v36 = vmul.f32 %v289_v26, %v289_v26 }
 0x12e   :  { %v348_v37 = vmul.f32 %v334_v31, %v334_v31  ;;  %v349_v38 = vmul.f32 %v335_v32, %v335_v32 }
 0x12f   :  { %337 = vadd.xlane.f32.xlu1 %v336_v33  ;;  %340 = vadd.xlane.f32.xlu0 %v339_v34  ;;  %v350_v39 = vadd.f32 %v347_v36, %v346_v35 }
 0x130   :  { %v353_v40 = vadd.f32 %v349_v38, %v348_v37 }
 0x133   :  { %351 = vadd.xlane.f32.xlu1 %v350_v39  ;;  %354 = vadd.xlane.f32.xlu0 %v353_v40 }
 0x1bc   :  { %v338_v41 = vpop.xlane.xlu1 %337  ;;  %v341_v42 = vpop.xlane.xlu0 %340 }
 0x1bd   :  { %344 = vst.msk [vmem:[%s545_s5] sm:$0xff] %vm165_vm2, %v338_v41  ;;  %345 = vst.msk [vmem:[%s545_s5 + $0x8] sm:$0xff] %vm165_vm2, %v341_v42 }
 0x1c0   :  { %v352_v43 = vpop.xlane.xlu1 %351  ;;  %v355_v44 = vpop.xlane.xlu0 %354 }
 0x1c1   :  { %358 = vst.msk [vmem:[%s546_s6] sm:$0xff] %vm165_vm2, %v352_v43  ;;  %359 = vst.msk [vmem:[%s546_s6 + $0x8] sm:$0xff] %vm165_vm2, %v355_v44 }

// kernel: separable_conv_block.3
= control target key start
LH: loop header
LB: loop body
LE: loop exit
PB: predicated region body
PF: predicated region fallthrough
CT: control target
= control target key end

     0   :  { %v389_v0 = vmov 6   ;;  %v390_v1 = vmov 0   ;;  %v391_v3 = vmov 2   ;;  %v392_v4 = vmov 3   ;;  %s394_s25 = smov 16   ;;  %s398_s27 = smov 112   ;;  %s539_s1 = inlined_call_operand.vmem [shape: f32[8,9], index: 1, kind: input, shape index: {}]   ;;  %s540_s0 = inlined_call_operand.vmem [shape: f32[1,8,256], index: 0, kind: input, shape index: {}]   ;;  %s541_s2 = inlined_call_operand.vmem [shape: f32[8,4], index: 2, kind: input, shape index: {}]   ;;  %s542_s4 = inlined_call_operand.vmem [shape: f32[2,256], index: 4, kind: input, shape index: {}]   ;;  %s543_s3 = inlined_call_operand.vmem [shape: f32[16,1], index: 3, kind: input, shape index: {}]   ;;  %s544_s5 = inlined_call_operand.vmem [shape: f32[2,256], index: 5, kind: input, shape index: {}]   ;;  %s545_s6 = inlined_call_operand.vmem [shape: f32[1,16,256], index: 6, kind: output, shape index: {}]  }
   0x1   :  { %376 = vset.pattern.permute.xlu1 %v389_v0  ;;  %374 = vset.pattern.permute.xlu0 %v390_v1  ;;  %v25_v2 = vld [vmem:[%s539_s1] sm:$0xff]  ;;  %v444_v5 = vld [vmem:[%s540_s0 + $0x8] sm:$0xff]  ;;  %v393_v6 = vmov 5   ;;  %v395_v7 = vmov 8   ;;  %v396_v9 = vmov 4   ;;  %v397_v10 = vmov 1  }
   0x2   :  { %108 = vperm.xlu1 %376, %v25_v2   ;;  %94 = vperm.xlu0 %374, %v25_v2   ;;  %v450_v8 = vld [vmem:[%s540_s0] sm:$0xff]  ;;  %v399_v12 = vmov 7   ;;  %v42_v13 = vlaneseq  ;;  %vm36_vm0 = vcmask 130048   ;;  %vm66_vm1 = vcmask 916480   ;;  %s401_s30 = smov 127  }
   0x3   :  { %v458_v11 = vld [vmem:[%s541_s2] sm:$0xff]  ;;  %vm166_vm2 = vcmask 7168   ;;  %vm200_vm3 = vcmask 1039360  }
   0x4   :  { %v465_v16 = vshrl.u32 %v42_v13, 7  ;;  %v27_v20 = vld [vmem:[%s542_s4] sm:$0xf]  ;;  %s400_s4 = smov 1  }
   0x6   :  { %377 = vset.pattern.permute.xlu1 %v391_v3  ;;  %375 = vset.pattern.permute.xlu0 %v392_v4  ;;  %v468_v18 = vsub.s32 0, %v465_v16  ;;  %v471_v19 = vsub.s32 2, %v465_v16  ;;  %v479_v25 = vsub.s32 1, %v465_v16  ;;  %v482_v26 = vsub.s32 3, %v465_v16 }
   0x7   :  { %138 = vperm.xlu1 %377, %v25_v2   ;;  %100 = vperm.xlu0 %375, %v25_v2  }
   0x8   :  { %v45_v23 = vrot.slane %v27_v20, %v468_v18  ;;  %v49_v24 = vrot.slane %v27_v20, %v471_v19  ;;  %v75_v33 = vrot.slane %v27_v20, %v479_v25  ;;  %v79_v34 = vrot.slane %v27_v20, %v482_v26 }
   0xa   :  { %v55_v28 = vrot.slane %v45_v23, %v468_v18  ;;  %v59_v29 = vrot.slane %v49_v24, %v468_v18  ;;  %v85_v38 = vrot.slane %v75_v33, %v479_v25  ;;  %v89_v39 = vrot.slane %v79_v34, %v479_v25  ;;  %v28_v23 = vld [vmem:[%s544_s5] sm:$0xf] }
   0xb   :  { %378 = vset.pattern.permute.xlu1 %v393_v6  ;;  %30 = vrot.lane.b32.xlu0 %v444_v5, %s394_s25 }
   0xc   :  { %144 = vperm.xlu1 %378, %v25_v2   ;;  %379 = vset.pattern.permute.xlu0 %v395_v7 }
   0xf   :  { %152 = vperm.xlu0 %379, %v25_v2  }
  0x10   :  { %34 = vrot.lane.b32.xlu1 %v450_v8, %s394_s25 }
  0x11   :  { %381 = vset.pattern.permute.xlu1 %v396_v9 }
  0x13   :  { %380 = vset.pattern.permute.xlu0 %v397_v10 }
  0x14   :  { %116 = vperm.xlu0 %380, %v25_v2   ;;  %62 = vrot.lane.b32.xlu1 %v450_v8, %s398_s27 }
  0x18   :  { %64 = vrot.lane.b32.xlu1 %v444_v5, %s398_s27  ;;  %383 = vset.pattern.permute.xlu0 %v390_v1 }
  0x19   :  { %238 = vperm.xlu0 %383, %v458_v11  }
  0x1c   :  { %122 = vperm.xlu1 %381, %v25_v2  }
  0x1d   :  { %386 = vset.pattern.permute.xlu0 %v392_v4 }
  0x20   :  { %382 = vset.pattern.permute.xlu1 %v399_v12 }
  0x21   :  { %130 = vperm.xlu1 %382, %v25_v2  }
  0x25   :  { %384 = vset.pattern.permute.xlu1 %v397_v10 }
  0x26   :  { %252 = vperm.xlu1 %384, %v458_v11  }
  0x2a   :  { %385 = vset.pattern.permute.xlu1 %v391_v3 }
  0x2b   :  { %268 = vperm.xlu1 %385, %v458_v11  }
  0x2f   :  { %387 = vset.pattern.permute.xlu1 %v390_v1 }
  0x81   :  { %v109_v14 = vpop.permute.xlu1 %108  ;;  %v95_v15 = vpop.permute.xlu0 %94 }
  0x86   :  { %v139_v17 = vpop.permute.xlu1 %138  ;;  %v101_v21 = vpop.permute.xlu0 %100 }
  0x87   :  { %v103_v41 = vmul.f32 %v101_v21, %v450_v8  ;;  %v104_v42 = vmul.f32 %v101_v21, %v444_v5  ;;  %v338_v21 = vld [vmem:[%s543_s3 + $0x8] sm:$0xff] }
  0x8a   :  { %v31_v27 = vpop.permute.xlu0 %30 }
  0x8b   :  { %v145_v22 = vpop.permute.xlu1 %144 }
  0x8c   :  { %v147_v57 = vmul.f32 %v145_v22, %v450_v8  ;;  %v148_v58 = vmul.f32 %v145_v22, %v444_v5 }
  0x8e   :  { %v153_v40 = vpop.permute.xlu0 %152 }
  0x8f   :  { %v35_v30 = vpop.permute.xlu1 %34 }
  0x90   :  { %v37_v31 = vsel %vm36_vm0, %v35_v30, %v31_v27  ;;  %v40_v32 = vsel %vm36_vm0, %v31_v27, %v35_v30 }
  0x91   :  { %v60_v35 = vmul.f32 %v55_v28, %v40_v32  ;;  %v61_v36 = vmul.f32 %v59_v29, %v37_v31  ;;  %v175_v28 = vrot.slane %v28_v23, %v468_v18  ;;  %v179_v29 = vrot.slane %v28_v23, %v471_v19 }
  0x92   :  { %v209_v31 = vrot.slane %v28_v23, %v479_v25 }
  0x93   :  { %v63_v37 = vpop.permute.xlu1 %62  ;;  %v97_v43 = vmul.f32 %v95_v15, %v60_v35  ;;  %v98_v44 = vmul.f32 %v95_v15, %v61_v36  ;;  %v141_v50 = vmul.f32 %v139_v17, %v60_v35  ;;  %v142_v51 = vmul.f32 %v139_v17, %v61_v36  ;;  %v117_v59 = vpop.permute.xlu0 %116 }
  0x94   :  { %v119_v6 = vmul.f32 %v117_v59, %v60_v35  ;;  %v120_v7 = vmul.f32 %v117_v59, %v61_v36  ;;  %v189_v30 = vrot.slane %v179_v29, %v468_v18 }
  0x95   :  { %v106_v53 = vadd.f32 %v104_v42, %v98_v44  ;;  %v105_v55 = vadd.f32 %v103_v41, %v97_v43  ;;  %v149_v3 = vadd.f32 %v147_v57, %v141_v50  ;;  %v150_v4 = vadd.f32 %v148_v58, %v142_v51 }
  0x96   :  { %v293_v50 = vsub.s32 4, %v465_v16  ;;  %v303_v51 = vsub.s32 5, %v465_v16  ;;  %v315_v58 = vsub.s32 6, %v465_v16 }
  0x97   :  { %v65_v45 = vpop.permute.xlu1 %64 }
  0x98   :  { %v67_v46 = vsel %vm66_vm1, %v63_v37, %v65_v45  ;;  %v71_v47 = vsel %vm66_vm1, %v65_v45, %v63_v37  ;;  %v239_v24 = vpop.permute.xlu0 %238 }
  0x99   :  { %v90_v48 = vmul.f32 %v85_v38, %v67_v46  ;;  %v91_v49 = vmul.f32 %v89_v39, %v71_v47  ;;  %v219_v38 = vrot.slane %v209_v31, %v479_v25 }
  0x9b   :  { %v123_v52 = vpop.permute.xlu1 %122  ;;  %v112_v54 = vmul.f32 %v109_v14, %v91_v49  ;;  %v111_v56 = vmul.f32 %v109_v14, %v90_v48  ;;  %v155_v60 = vmul.f32 %v153_v40, %v90_v48  ;;  %v156_v61 = vmul.f32 %v153_v40, %v91_v49 }
  0x9c   :  { %v125_v62 = vmul.f32 %v123_v52, %v450_v8  ;;  %v126_v63 = vmul.f32 %v123_v52, %v444_v5  ;;  %v337_v5 = vld [vmem:[%s543_s3] sm:$0xff] }
  0x9d   :  { %v114_v0 = vadd.f32 %v112_v54, %v106_v53  ;;  %v113_v2 = vadd.f32 %v111_v56, %v105_v55  ;;  %v157_v10 = vadd.f32 %v155_v60, %v149_v3  ;;  %v158_v12 = vadd.f32 %v156_v61, %v150_v4 }
  0x9e   :  { %v127_v13 = vadd.f32 %v125_v62, %v119_v6  ;;  %v128_v14 = vadd.f32 %v126_v63, %v120_v7  ;;  %v327_v6 = vsub.s32 7, %v465_v16 }
  0x9f   :  { %160 = vrot.lane.b32.xlu0 %v114_v0, %s400_s4  ;;  %164 = vrot.lane.b32.xlu1 %v113_v2, %s400_s4 }
  0xa0   :  { %v131_v9 = vpop.permute.xlu1 %130 }
  0xa1   :  { %v133_v15 = vmul.f32 %v131_v9, %v90_v48  ;;  %v134_v17 = vmul.f32 %v131_v9, %v91_v49 }
  0xa3   :  { %v135_v20 = vadd.f32 %v133_v15, %v127_v13  ;;  %v136_v8 = vadd.f32 %v134_v17, %v128_v14  ;;  %196 = vrot.lane.b32.xlu0 %v157_v10, %s401_s30  ;;  %198 = vrot.lane.b32.xlu1 %v158_v12, %s401_s30 }
  0xa5   :  { %v253_v22 = vpop.permute.xlu1 %252 }
  0xa7   :  { %284 = vperm.xlu0 %386, %v458_v11   ;;  %341 = vperm.xlu1 %387, %v337_v5   ;;  %v185_v11 = vrot.slane %v175_v28, %v468_v18 }
  0xaa   :  { %v269_v27 = vpop.permute.xlu1 %268 }
  0xab   :  { %346 = vperm.xlu1 %387, %v338_v21   ;;  %388 = vset.pattern.permute.xlu0 %v390_v1  ;;  %v213_v1 = vrot.slane %v28_v23, %v482_v26 }
  0xad   :  { %v223_v39 = vrot.slane %v213_v1, %v479_v25 }
 0x111   :  { %v161_v32 = vpop.permute.xlu0 %160  ;;  %v165_v33 = vpop.permute.xlu1 %164 }
 0x112   :  { %v167_v34 = vsel %vm166_vm2, %v165_v33, %v161_v32  ;;  %v170_v35 = vsel %vm166_vm2, %v161_v32, %v165_v33 }
 0x113   :  { %v190_v36 = vmul.f32 %v185_v11, %v170_v35  ;;  %v191_v37 = vmul.f32 %v189_v30, %v167_v34 }
 0x115   :  { %v197_v40 = vpop.permute.xlu0 %196  ;;  %v199_v41 = vpop.permute.xlu1 %198  ;;  %v192_v44 = vadd.f32 %v190_v36, %v135_v20  ;;  %v193_v45 = vadd.f32 %v191_v37, %v136_v8 }
 0x116   :  { %v201_v42 = vsel %vm200_vm3, %v197_v40, %v199_v41  ;;  %v205_v43 = vsel %vm200_vm3, %v199_v41, %v197_v40 }
 0x117   :  { %v224_v46 = vmul.f32 %v219_v38, %v201_v42  ;;  %v225_v47 = vmul.f32 %v223_v39, %v205_v43 }
 0x119   :  { %v226_v48 = vadd.f32 %v224_v46, %v192_v44  ;;  %v227_v49 = vadd.f32 %v225_v47, %v193_v45 }
 0x11b   :  { %v231_v52 = vrot.slane %v226_v48, %v468_v18  ;;  %v235_v53 = vrot.slane %v227_v49, %v468_v18  ;;  %v246_v54 = vrot.slane %v226_v48, %v479_v25  ;;  %v250_v55 = vrot.slane %v227_v49, %v479_v25 }
 0x11c   :  { %v294_v56 = vrot.slane %v226_v48, %v293_v50  ;;  %v298_v57 = vrot.slane %v227_v49, %v293_v50  ;;  %v262_v63 = vrot.slane %v226_v48, %v471_v19  ;;  %v266_v0 = vrot.slane %v227_v49, %v471_v19 }
 0x11d   :  { %v241_v59 = vmul.f32 %v239_v24, %v231_v52  ;;  %v242_v60 = vmul.f32 %v239_v24, %v235_v53  ;;  %v255_v61 = vmul.f32 %v253_v22, %v246_v54  ;;  %v256_v62 = vmul.f32 %v253_v22, %v250_v55 }
 0x11e   :  { %v299_v2 = vmul.f32 %v294_v56, %v239_v24  ;;  %v300_v3 = vmul.f32 %v298_v57, %v239_v24  ;;  %v304_v4 = vrot.slane %v226_v48, %v303_v51  ;;  %v308_v18 = vrot.slane %v227_v49, %v303_v51 }
 0x11f   :  { %v316_v7 = vrot.slane %v226_v48, %v315_v58  ;;  %v320_v25 = vrot.slane %v227_v49, %v315_v58  ;;  %v257_v9 = vadd.f32 %v255_v61, %v241_v59  ;;  %v258_v10 = vadd.f32 %v256_v62, %v242_v60 }
 0x120   :  { %v309_v12 = vmul.f32 %v304_v4, %v253_v22  ;;  %v310_v13 = vmul.f32 %v308_v18, %v253_v22  ;;  %v271_v14 = vmul.f32 %v269_v27, %v262_v63  ;;  %v272_v15 = vmul.f32 %v269_v27, %v266_v0 }
 0x121   :  { %v321_v8 = vmul.f32 %v316_v7, %v269_v27  ;;  %v322_v5 = vmul.f32 %v320_v25, %v269_v27  ;;  %v278_v19 = vrot.slane %v226_v48, %v482_v26  ;;  %v282_v21 = vrot.slane %v227_v49, %v482_v26 }
 0x122   :  { %v311_v17 = vadd.f32 %v309_v12, %v299_v2  ;;  %v312_v20 = vadd.f32 %v310_v13, %v300_v3  ;;  %v328_v23 = vrot.slane %v226_v48, %v327_v6  ;;  %v332_v24 = vrot.slane %v227_v49, %v327_v6 }
 0x123   :  { %v273_v16 = vadd.f32 %v271_v14, %v257_v9  ;;  %v274_v29 = vadd.f32 %v272_v15, %v258_v10 }
 0x124   :  { %v323_v30 = vadd.f32 %v321_v8, %v311_v17  ;;  %v324_v31 = vadd.f32 %v322_v5, %v312_v20 }
 0x126   :  { %v285_v28 = vpop.permute.xlu0 %284  ;;  %v342_v11 = vpop.permute.xlu1 %341 }
 0x127   :  { %v287_v1 = vmul.f32 %v285_v28, %v278_v19  ;;  %v288_v22 = vmul.f32 %v285_v28, %v282_v21  ;;  %v333_v32 = vmul.f32 %v328_v23, %v285_v28  ;;  %v334_v33 = vmul.f32 %v332_v24, %v285_v28 }
 0x129   :  { %v289_v34 = vadd.f32 %v287_v1, %v273_v16  ;;  %v290_v35 = vadd.f32 %v288_v22, %v274_v29  ;;  %v335_v36 = vadd.f32 %v333_v32, %v323_v30  ;;  %v336_v27 = vadd.f32 %v334_v33, %v324_v31 }
 0x12a   :  { %v347_v37 = vpop.permute.xlu1 %346 }
 0x12b   :  { %v349_v38 = vadd.f32 %v342_v11, %v289_v34  ;;  %v350_v39 = vadd.f32 %v342_v11, %v290_v35  ;;  %v351_v26 = vadd.f32 %v347_v37, %v335_v36  ;;  %v352_v40 = vadd.f32 %v347_v37, %v336_v27 }
 0x12d   :  { %353 = vst [vmem:[%s545_s6] sm:$0xff] %v349_v38  ;;  %354 = vst [vmem:[%s545_s6 + $0x8] sm:$0xff] %v350_v39 }
 0x12e   :  { %355 = vst [vmem:[%s545_s6 + $0x10] sm:$0xff] %v351_v26  ;;  %356 = vst [vmem:[%s545_s6 + $0x18] sm:$0xff] %v352_v40 }

</bundles_post_ra>
